<compile_context>
chip_gen: v7x
topology: tpu7x:2x2x1
jax: 0.10.0
libtpu: 0.0.40
codegen_flags: <defaults>
</compile_context>

<pallas_src>
import math
import functools

import jax
import jax.numpy as jnp
from jax import lax
from jax.experimental import pallas as pl
from jax.experimental.pallas import tpu as pltpu


def _ca_kernel(w_ref, cid_ref, x_ref, o_ref, *, ksize, channels, hw_true):
    # w_ref   : SMEM (ksize,) f32          -- shared Conv1d weights (no bias)
    # cid_ref : VMEM (R, 1) int32          -- channel index of each row (row = b*C + c)
    # x_ref   : VMEM (R, HWp)              -- R = Bb * channels, HWp = padded H*W
    # o_ref   : VMEM (R, HWp)
    x = x_ref[...].astype(jnp.float32)
    R, HWp = x.shape
    pad = (ksize - 1) // 2

    # (1) pooled stats over the spatial (lane) axis; channels stay on sublanes.
    if HWp != hw_true:  # spatial axis was zero-padded -> mask pads out of the max
        lane = lax.broadcasted_iota(jnp.int32, (R, HWp), 1)
        x_for_max = jnp.where(lane < hw_true, x, -jnp.inf)
    else:
        x_for_max = x
    m_avg = jnp.sum(x, axis=-1, keepdims=True) * (1.0 / hw_true)      # (R, 1)
    m_max = jnp.max(x_for_max, axis=-1, keepdims=True)                # (R, 1)
    p = m_avg + m_max   # conv(avg) + conv(max) == conv(avg + max)

    # (2) zero-padded 1D conv along the channel (sublane) axis as ksize shifted FMAs:
    #     out[c] = sum_j w[j] * p[c + j - pad].  Rolls hit the XLU, FMAs the VPU.
    cid = cid_ref[...]
    y = jnp.zeros((R, 1), jnp.float32)
    for j in range(ksize):                      # ksize is tiny & static
        shift = pad - j
        sh = shift % R
        src = p if sh == 0 else pltpu.roll(p, shift=sh, axis=0)
        # valid iff source channel (c - shift) stays inside [0, channels) of the same
        # batch element; this also kills the cyclic wrap of the roll.
        valid = (cid >= shift) & (cid < channels + shift)
        y = y + w_ref[j] * jnp.where(valid, src, 0.0)

    # (3) sigmoid gate, (4) rescale: broadcast the (R, 1) column across lanes.
    scale = jax.nn.sigmoid(y)
    # Re-read x for the rescale so the compiler need not keep the whole tile live.
    o_ref[...] = (x_ref[...].astype(jnp.float32) * scale).astype(o_ref.dtype)


def channel_attention_forward(x, conv_w, *, tile_budget_bytes=4 << 20):
    """x: (B, C, H, W); conv_w: (1, 1, k) Conv1d weight (no bias)."""
    B, C, H, W = x.shape
    HW = H * W
    ksize = int(conv_w.shape[-1])

    # Lane-dense spatial axis: pad H*W up to a multiple of 128 with zeros; the kernel
    # masks the pads out of the max and divides the sum by the true H*W.
    HW_pad = 128 * ((HW + 127) // 128)
    xf = x.reshape(B, C, HW)
    if HW_pad != HW:
        xf = jnp.pad(xf, ((0, 0), (0, 0), (0, HW_pad - HW)))
    x2d = xf.reshape(B * C, HW_pad)

    # Pack Bb batch elements per grid step: largest tile under budget, sublane-aligned
    # (Bb*C % 8 == 0 or full), preferring >= 2 grid steps so v7x's two TCs both work.
    per_b = C * HW_pad * x2d.dtype.itemsize
    divisors = [d for d in range(1, B + 1) if B % d == 0]
    legal = [d for d in divisors if ((d * C) % 8 == 0) or (d == B)]
    fits = [d for d in legal if d * per_b <= tile_budget_bytes] or [min(legal)]
    multi = [d for d in fits if (B // d) >= 2]
    Bb = max(multi) if multi else max(fits)
    nb = B // Bb
    R = Bb * C

    tile_bytes = R * HW_pad * x2d.dtype.itemsize
    # in + out, double-buffered, plus headroom for the tiny pooled/gate columns.
    # TODO(synk): for very large C*H*W (tile > ~12 MiB) split H*W onto a second grid
    # axis (pool pass + rescale pass) so the working set also fits v7x's 64 MiB VMEM.
    vmem_limit = int(min(max(16 << 20, 4 * tile_bytes + (4 << 20)), 112 << 20))

    chan_idx = jnp.tile(jnp.arange(C, dtype=jnp.int32), B).reshape(B * C, 1)

    out2d = pl.pallas_call(
        functools.partial(_ca_kernel, ksize=ksize, channels=C, hw_true=HW),
        out_shape=jax.ShapeDtypeStruct((B * C, HW_pad), x.dtype),
        grid=(nb,),
        in_specs=[
            pl.BlockSpec(memory_space=pltpu.MemorySpace.SMEM),      # conv weights
            pl.BlockSpec((R, 1), lambda i: (i, 0)),                 # channel indices
            pl.BlockSpec((R, HW_pad), lambda i: (i, 0)),            # x tile
        ],
        out_specs=pl.BlockSpec((R, HW_pad), lambda i: (i, 0)),
        compiler_params=pltpu.CompilerParams(
            dimension_semantics=("parallel",),
            vmem_limit_bytes=vmem_limit),
    )(conv_w.reshape(-1).astype(jnp.float32), chan_idx, x2d)

    out = out2d if HW_pad == HW else out2d[:, :HW]
    return out.reshape(B, C, H, W)


def _reference(x, conv_w):
    """Pure-JAX reference matching the PyTorch forward (avg + max branches)."""
    B, C, H, W = x.shape
    k = conv_w.shape[-1]
    pad = (k - 1) // 2
    w = conv_w.reshape(-1)
    avg = x.mean(axis=(2, 3))                                   # (B, C)
    mx = x.max(axis=(2, 3))                                     # (B, C)

    def conv1d(v):
        vp = jnp.pad(v, ((0, 0), (pad, pad)))
        return jnp.stack(
            [jnp.sum(vp[:, c:c + k] * w, axis=-1) for c in range(C)], axis=-1)

    gate = jax.nn.sigmoid(conv1d(avg) + conv1d(mx))
    return x * gate[:, :, None, None]


if __name__ == "__main__":
    # Module construction: channels=16 -> kernel_size = int(|(log2(16)+1)/2|) = 2 -> 3 (odd)
    channel, b_hyper, gamma = 16, 1, 2
    kernel_size = int(abs((math.log(channel, 2) + b_hyper) / gamma))
    kernel_size = kernel_size if kernel_size % 2 else kernel_size + 1

    key = jax.random.PRNGKey(0)
    kx, kw = jax.random.split(key)

    B, C, H, W = 2, channel, 16, 16
    x = jax.random.normal(kx, (B, C, H, W), dtype=jnp.float32)

    # Deterministic Conv1d(1, 1, k, bias=False) weight (kaiming-uniform-ish bound)
    bound = 1.0 / math.sqrt(kernel_size)
    conv_w = jax.random.uniform(
        kw, (1, 1, kernel_size), dtype=jnp.float32, minval=-bound, maxval=bound)

    out = jax.block_until_ready(channel_attention_forward(x, conv_w))
    ref = _reference(x, conv_w)

    assert out.shape == x.shape and out.dtype == x.dtype
    assert jnp.allclose(out, ref, atol=3e-5, rtol=1e-5), "mismatch vs reference"

    print("KERNEL_OK")
</pallas_src>

<mosaic_0001>
module attributes {stable_mosaic.version = 11 : i64} {
  func.func @_ca_kernel(%arg0: i32, %arg1: memref<3xf32, #tpu.memory_space<smem>>, %arg2: memref<16x1xi32, #tpu.memory_space<vmem>>, %arg3: memref<16x256xf32, #tpu.memory_space<vmem>>, %arg4: memref<16x256xf32, #tpu.memory_space<vmem>>) attributes {dimension_semantics = [#tpu.dimension_semantics<parallel>], iteration_bounds = array<i64: 2>, scalar_prefetch = 0 : i64, scratch_operands = 0 : i64, tpu.core_type = #tpu.core_type<tc>, window_params = [{transform_indices = @transform_0, window_bounds = array<i64: 3>}, {transform_indices = @transform_1, window_bounds = array<i64: 16, 1>}, {transform_indices = @transform_2, window_bounds = array<i64: 16, 256>}, {transform_indices = @transform_3, window_bounds = array<i64: 16, 256>}]} {
    %c0 = arith.constant 0 : index
    %c0_0 = arith.constant 0 : index
    %0 = vector.load %arg3[%c0, %c0_0] : memref<16x256xf32, #tpu.memory_space<vmem>>, vector<16x256xf32>
    %cst = arith.constant dense<0.000000e+00> : vector<16xf32>
    %1 = vector.multi_reduction <add>, %0, %cst [1] : vector<16x256xf32> to vector<16xf32>
    %2 = vector.shape_cast %1 : vector<16xf32> to vector<16x1xf32>
    %cst_1 = arith.constant 3.906250e-03 : f32
    %3 = vector.broadcast %cst_1 : f32 to vector<16x1xf32>
    %4 = arith.mulf %2, %3 : vector<16x1xf32>
    %cst_2 = arith.constant dense<0xFF800000> : vector<16xf32>
    %5 = vector.multi_reduction <maximumf>, %0, %cst_2 [1] : vector<16x256xf32> to vector<16xf32>
    %6 = vector.shape_cast %5 : vector<16xf32> to vector<16x1xf32>
    %7 = arith.addf %4, %6 : vector<16x1xf32>
    %c0_3 = arith.constant 0 : index
    %c0_4 = arith.constant 0 : index
    %8 = vector.load %arg2[%c0_3, %c0_4] : memref<16x1xi32, #tpu.memory_space<vmem>>, vector<16x1xi32>
    %cst_5 = arith.constant 0.000000e+00 : f32
    %9 = vector.broadcast %cst_5 : f32 to vector<16x1xf32>
    %c1_i32 = arith.constant 1 : i32
    %10 = tpu.dynamic_rotate %7 by %c1_i32 dim 0 : vector<16x1xf32>, i32 -> vector<16x1xf32>
    %c1_i32_6 = arith.constant 1 : i32
    %11 = vector.broadcast %c1_i32_6 : i32 to vector<16x1xi32>
    %12 = arith.cmpi sge, %8, %11 : vector<16x1xi32>
    %c17_i32 = arith.constant 17 : i32
    %13 = vector.broadcast %c17_i32 : i32 to vector<16x1xi32>
    %14 = arith.cmpi slt, %8, %13 : vector<16x1xi32>
    %15 = arith.andi %12, %14 : vector<16x1xi1>
    %c0_7 = arith.constant 0 : index
    %16 = memref.load %arg1[%c0_7] : memref<3xf32, #tpu.memory_space<smem>>
    %cst_8 = arith.constant 0.000000e+00 : f32
    %17 = vector.broadcast %cst_8 : f32 to vector<16x1xf32>
    %18 = arith.select %15, %10, %17 : vector<16x1xi1>, vector<16x1xf32>
    %19 = vector.broadcast %16 : f32 to vector<16x1xf32>
    %20 = arith.mulf %19, %18 : vector<16x1xf32>
    %21 = arith.addf %9, %20 : vector<16x1xf32>
    %c0_i32 = arith.constant 0 : i32
    %22 = vector.broadcast %c0_i32 : i32 to vector<16x1xi32>
    %23 = arith.cmpi sge, %8, %22 : vector<16x1xi32>
    %c16_i32 = arith.constant 16 : i32
    %24 = vector.broadcast %c16_i32 : i32 to vector<16x1xi32>
    %25 = arith.cmpi slt, %8, %24 : vector<16x1xi32>
    %26 = arith.andi %23, %25 : vector<16x1xi1>
    %c1 = arith.constant 1 : index
    %27 = memref.load %arg1[%c1] : memref<3xf32, #tpu.memory_space<smem>>
    %cst_9 = arith.constant 0.000000e+00 : f32
    %28 = vector.broadcast %cst_9 : f32 to vector<16x1xf32>
    %29 = arith.select %26, %7, %28 : vector<16x1xi1>, vector<16x1xf32>
    %30 = vector.broadcast %27 : f32 to vector<16x1xf32>
    %31 = arith.mulf %30, %29 : vector<16x1xf32>
    %32 = arith.addf %21, %31 : vector<16x1xf32>
    %c15_i32 = arith.constant 15 : i32
    %33 = tpu.dynamic_rotate %7 by %c15_i32 dim 0 : vector<16x1xf32>, i32 -> vector<16x1xf32>
    %c-1_i32 = arith.constant -1 : i32
    %34 = vector.broadcast %c-1_i32 : i32 to vector<16x1xi32>
    %35 = arith.cmpi sge, %8, %34 : vector<16x1xi32>
    %c15_i32_10 = arith.constant 15 : i32
    %36 = vector.broadcast %c15_i32_10 : i32 to vector<16x1xi32>
    %37 = arith.cmpi slt, %8, %36 : vector<16x1xi32>
    %38 = arith.andi %35, %37 : vector<16x1xi1>
    %c2 = arith.constant 2 : index
    %39 = memref.load %arg1[%c2] : memref<3xf32, #tpu.memory_space<smem>>
    %cst_11 = arith.constant 0.000000e+00 : f32
    %40 = vector.broadcast %cst_11 : f32 to vector<16x1xf32>
    %41 = arith.select %38, %33, %40 : vector<16x1xi1>, vector<16x1xf32>
    %42 = vector.broadcast %39 : f32 to vector<16x1xf32>
    %43 = arith.mulf %42, %41 : vector<16x1xf32>
    %44 = arith.addf %32, %43 : vector<16x1xf32>
    %45 = arith.negf %44 : vector<16x1xf32>
    %46 = math.exp %45 : vector<16x1xf32>
    %cst_12 = arith.constant 1.000000e+00 : f32
    %47 = vector.broadcast %cst_12 : f32 to vector<16x1xf32>
    %48 = arith.addf %47, %46 : vector<16x1xf32>
    %49 = arith.divf %47, %48 : vector<16x1xf32>
    %c0_13 = arith.constant 0 : index
    %c0_14 = arith.constant 0 : index
    %50 = vector.load %arg3[%c0_13, %c0_14] : memref<16x256xf32, #tpu.memory_space<vmem>>, vector<16x256xf32>
    %51 = vector.broadcast %49 : vector<16x1xf32> to vector<16x256xf32>
    %52 = arith.mulf %50, %51 : vector<16x256xf32>
    %c0_15 = arith.constant 0 : index
    %c0_16 = arith.constant 0 : index
    %53 = vector.load %arg4[%c0_15, %c0_16] : memref<16x256xf32, #tpu.memory_space<vmem>>, vector<16x256xf32>
    tpu.vector_store %arg4[%c0_15, %c0_16], %52 {strides = array<i32>} : memref<16x256xf32, #tpu.memory_space<vmem>>, vector<16x256xf32>,
    return
  }
  func.func @transform_0(%arg0: i32) -> i32 {
    %c0_i32 = arith.constant 0 : i32
    %c0_i32_0 = arith.constant 0 : i32
    return %c0_i32 : i32
  }
  func.func @transform_1(%arg0: i32) -> (i32, i32) {
    %c0_i32 = arith.constant 0 : i32
    %c0_i32_0 = arith.constant 0 : i32
    return %arg0, %c0_i32 : i32, i32
  }
  func.func @transform_2(%arg0: i32) -> (i32, i32) {
    %c0_i32 = arith.constant 0 : i32
    %c0_i32_0 = arith.constant 0 : i32
    return %arg0, %c0_i32 : i32, i32
  }
  func.func @transform_3(%arg0: i32) -> (i32, i32) {
    %c0_i32 = arith.constant 0 : i32
    %c0_i32_0 = arith.constant 0 : i32
    return %arg0, %c0_i32 : i32, i32
  }
}

</mosaic_0001>

<bundles_post_ra>
// kernel: tpu_custom_call.1
= control target key start
LH: loop header
LB: loop body
LE: loop exit
PB: predicated region body
PF: predicated region fallthrough
CT: control target
= control target key end

     0   :  { %8 = vsyncpa [#allocation5], 0  ;;  %s953_s0 = inlined_call_operand.vmem [shape: f32[3], index: 0, kind: input, shape index: {}]   ;;  %s954_s1 = inlined_call_operand.vmem [shape: s32[32,1], index: 1, kind: input, shape index: {}]   ;;  %s955_s2 = inlined_call_operand.hbm [shape: f32[32,256], index: 2, kind: input, shape index: {}]   ;;  %s956_s3 = inlined_call_operand.hbm [shape: f32[32,256], index: 3, kind: output, shape index: {}]  }
   0x1   :  { %9 = vsyncpa [#allocation3], 0 }
   0x2   :  { %11 = vsyncpa [#allocation3 + $0x1], 0 }
   0x3   :  { %12 = vsyncpa [#allocation4], 0 }
   0x4   :  { %14 = vsyncpa [#allocation4 + $0x1], 0  ;;  %s691_s12 = smov 0   ;;  %s693_s13 = smov 0  }
   0x5   :  { %s695_s14 = smov 0   ;;  %s697_s15 = smov 0  }
   0x6 LB: > { %s712_s16 = sadd.s32 4294967295, %s661_s15   ;;  %s446_s17 = sadd.s32 4294967294, %s661_s15   ;;  %s661_s15 = sphi %s697_s15, %s988_s15   ;;  %s657_s14 = sphi %s695_s14, %s987_s14   ;;  %s653_s13 = sphi %s693_s13, %s986_s13   ;;  %s649_s12 = sphi %s691_s12, %s985_s12  }
   0x7   : > { %s716_s18 = sadd.s32 1, %s661_s15   ;;  %s74_s19 = sadd.s32 1, %s657_s14 }
   0x8   : > { %s71_s20 = ssub.s32 %s661_s15, %s716_s18  ;;  %p81_p0 = scmp.ne.s32.totalorder %s657_s14, %s653_s13 }
   0x9   : > { %p72_p1 = scmp.eq.s32.totalorder %s71_s20, 0  ;;  %p82_p2 = scmp.eq.s32.totalorder %s661_s15, 0 }
   0xa   : > { %p87_p3 = scmp.ne.s32.totalorder %s653_s13, %s649_s12  ;;  %p958_p4 = scmp.eq.s32.totalorder %s712_s16, 0 }
   0xb   : > { %s728_s21 = scalar_select %p72_p1, %s657_s14, %s74_s19  }
   0xc   : > { %p730_p5 = por %p82_p2, %p81_p0  ;;  %p736_p6 = por %p958_p4, %p87_p3 }
   0xd   : > { %p111_p7 = scmp.eq.s32.totalorder %s712_s16, 1  ;;  %p117_p8 = scmp.eq.s32.totalorder %s446_s17, 1 }
   0xe   : > { %s961_s23 = scalar_select %p736_p6, 1, 0 }
   0xf   : > { %p447_p9 = scmp.ge.s32.totalorder %s661_s15, 1  ;;  %p124_p10 = scmp.lt.s32.totalorder %s661_s15, 3 }
  0x10   : > { %p743_p11 = por %p111_p7, %p81_p0  ;;  %p747_p12 = por %p117_p8, %p87_p3 }
  0x11   : > { %p751_p13 = pnand %p447_p9, %p124_p10  ;;  %s137_s29 = sshll.u32 %s953_s0, 4  ;;  %s138_s29 = int_to_ptr.vmem [resolvable:$true] %s137_s29 }
  0x12   : > { %s962_s24 = scalar_select %p743_p11, 1, 0 }
  0x13   : > { %s963_s25 = scalar_select %p747_p12, 1, 0 }
  0x14   : > { %p482_p1 = pneg %p751_p13  ;;  %p495_p2 = scmp.lt.s32.totalorder %s661_s15, 2 }
  0x15   : > { %s157_s4 = sand.u32 1, %s657_s14   ;;  %s546_s7 = scalar_lea.vmem %s138_s29, 16 }
  0x16   : > { %p764_p7 = pnand %p482_p1, %p958_p4  ;;  %p771_p3 = pnand %p495_p2, %p730_p5 }
  0x17   : > { %s450_s6 = sshll.u32 %s157_s4, 5  ;;  %p547_p8 = scmp.ne.s32.totalorder %s138_s29, %s546_s7 }
  0x18   : > { %p548_p9 = pneg %p764_p7  ;;  %p554_p12 = scmp.lt.s32.totalorder %s138_s29, %s138_s29 }
  0x19   : > { %p555_p11 = scmp.lt.s32.totalorder %s546_s7, %s546_s7 }
  0x1a   : > { %p549_p10 = pnand %p548_p9, %p547_p8 }
  0x1b   : > { %p556_p1 = por %p555_p11, %p554_p12 }
  0x1c   : > { %p550_p0 = pneg %p549_p10 }
  0x1e   : > { %p557_p4 = pnand %p556_p1, %p550_p0 }
  0x20   : > { %560 = shalt.err (!%p557_p4)
}
  0x21   : > { %s663_s8 = smov [#allocation2]   ;;  %s471_s9 = sshll.u32 %s661_s15, 9 }
  0x22   : > { %485 = dma.vmem_to_smem (!%p764_p7), %s138_s29, 16, %s663_s8, [#allocation5]  }
  0x23   : > { %s161_s10 = scalar_lea.vmem [#allocation6], %s450_s6  ;;  %s783_s20 = scalar_lea.hbm %s955_s2, %s471_s9 }
  0x24   : > { %s169_s11 = sshll.u32 %s161_s10, 4  ;;  %s787_s22 = scalar_lea.sflag [#allocation3], %s157_s4  ;;  %s785_s11 = int_to_ptr.vmem [resolvable:$true] %s169_s11 }
  0x25   : > { %s561_s27 = scalar_lea.hbm %s783_s20, 512  ;;  %p563_p5 = pneg %p771_p3 }
  0x26   : > { %p562_p4 = scmp.ne.s32.totalorder %s783_s20, %s561_s27  ;;  %s566_s30 = scalar_lea.hbm %s955_s2, 1024 }
  0x27   : > { %p567_p0 = scmp.lt.u32.totalorder %s783_s20, %s955_s2  ;;  %p568_p2 = scmp.lt.u32.totalorder %s566_s30, %s561_s27 }
  0x28   : > { %p564_p11 = pnand %p563_p5, %p562_p4  ;;  %p570_p8 = scmp.lt.u32.totalorder %s561_s27, %s783_s20 }
  0x29   : > { %p569_p7 = por %p568_p2, %p567_p0 }
  0x2a   : > { %p565_p12 = pneg %p564_p11 }
  0x2b   : > { %p571_p9 = por %p570_p8, %p569_p7 }
  0x2d   : > { %p572_p10 = pnand %p571_p9, %p565_p12 }
  0x2f   : > { %575 = shalt.err (!%p572_p10)
}
  0x30   : > { %s576_s4 = scalar_lea.vmem %s785_s11, 512  ;;  %s664_s8 = smov [#allocation6]  }
  0x31   : > { %p577_p1 = scmp.ne.s32.totalorder %s785_s11, %s576_s4  ;;  %s581_s9 = sshll.u32 %s664_s8, 4  ;;  %s582_s9 = int_to_ptr.vmem [resolvable:$false] %s581_s9 }
  0x32   : > { %s583_s10 = scalar_lea.vmem %s582_s9, 1024  ;;  %p584_p6 = scmp.lt.s32.totalorder %s785_s11, %s582_s9 }
  0x33   : > { %p579_p4 = pnand %p577_p1, %p563_p5  ;;  %p585_p0 = scmp.lt.s32.totalorder %s583_s10, %s576_s4 }
  0x35   : > { %p580_p11 = pneg %p579_p4  ;;  %p586_p2 = por %p585_p0, %p584_p6 }
  0x37   : > { %p587_p7 = pnand %p586_p2, %p580_p11 }
  0x39   : > { %590 = shalt.err (!%p587_p7)
}
  0x3a   : > { %s665_s17 = smov 256   ;;  %s666_s19 = smov 16  }
  0x3b   : > { %489 = dma.hbm_to_vmem [thread:$0]  (!%p771_p3), %s783_s20, 512, %s785_s11, %s787_s22, %s665_s17, %s665_s17, %s666_s19  }
  0x3c   : > { %181 = sbr.rel (%p751_p13) target bundleno = 409 (0x199), region = 32  ;;  %p967_p5 = scmp.eq.s32.totalorder (!%p751_p13), %s712_s16, 0 }
  0x43   : > { %636 = dma.done.wait (%p967_p5), [#allocation5], 16   ;;  %p968_p12 = pmov %p967_p5 }
  0x44   : > { %s822_s27 = sand.u32 1, %s653_s13   ;;  %p969_p6 = scmp.ne.s32.totalorder %s961_s23, 0 }
  0x45   : > { %638 = vsyncadd (%p968_p12), [#allocation5], 4294967280  ;;  %s456_s28 = sshll.u32 %s822_s27, 5  ;;  %s188_s29 = scalar_lea.sflag [#allocation3], %s822_s27 }
  0x46   : > { %s191_s5 = scalar_lea.vmem [#allocation6], %s456_s28 }
  0x47   : > { %640 = dma.done.wait (%p969_p6), %s188_s29, 512  }
  0x48   : > { %642 = vsyncadd (%p969_p6), %s188_s29, 4294966784 }
  0x49   : > { %196 = sfence }
  0x4a   : > { %v832_v0 = vld [vmem:[%s191_s5] sm:$0xff]  ;;  %v834_v1 = vld [vmem:[%s191_s5 + $0x8] sm:$0xff]  ;;  %v836_v2 = vld [vmem:[%s191_s5 + $0x10] sm:$0xff]  ;;  %v667_v8 = vmov 0   ;;  %s458_s23 = sshll.u32 %s712_s16, 1  ;;  %s852_s30 = sld [smem:[#allocation2 + $0x1]]  ;;  %v252_v13 = vlaneseq }
  0x4b   : > { %v232_v3 = vadd.f32 %v834_v1, %v832_v0  ;;  %v240_v4 = vmax.f32 %v832_v0, %v834_v1  ;;  %v842_v5 = vld [vmem:[%s191_s5 + $0x18] sm:$0xff]  ;;  %537 = vset.pattern.permute.xlu1 %v667_v8  ;;  %536 = vset.pattern.permute.xlu0 %v667_v8  ;;  %p221_p13 = scmp.lt.s32.totalorder %s458_s23, 3  ;;  %s854_s6 = sld [smem:[#allocation2]] }
  0x4c   : > { %v235_v6 = vadd.f32 %v842_v5, %v836_v2  ;;  %v243_v7 = vmax.f32 %v836_v2, %v842_v5  ;;  %s856_s7 = sld [smem:[#allocation2 + $0x2]]  ;;  %v253_v17 = vshrl.u32 %v252_v13, 7  ;;  %s219_s4 = scalar_lea.vmem [#allocation7], %s456_s28 }
  0x4d   : > { %233 = vadd.xlane.f32.xlu0 %v232_v3  ;;  %241 = vmax.xlane.f32.xlu1 %v240_v4  ;;  %s990_s23 = smov (!%p221_p13, %s458_s23), 3  ;;  %s349_s8 = sshll.u32 %s219_s4, 4  ;;  %s900_s8 = int_to_ptr.vmem [resolvable:$true] %s349_s8 }
  0x4e   : > { %s459_s26 = sshll.u32 %s990_s23, 3  ;;  %s473_s9 = sshll.u32 %s712_s16, 9 }
  0x4f   : > { %s224_s22 = scalar_lea.vmem %s954_s1, %s459_s26  ;;  %s907_s19 = scalar_lea.hbm %s956_s3, %s473_s9 }
  0x50   : > { %v248_v9 = vld [vmem:[%s224_s22] sm:$0xff]  ;;  %v249_v10 = vld [vmem:[%s224_s22 + $0x8] sm:$0xff]  ;;  %v280_v25 = vstv %s852_s30  ;;  %s335_s16 = scalar_lea.sflag [#allocation4], %s822_s27  ;;  %s591_s28 = scalar_lea.vmem %s900_s8, 512 }
  0x51   : > { %236 = vadd.xlane.f32.xlu0 %v235_v6  ;;  %244 = vmax.xlane.f32.xlu1 %v243_v7  ;;  %vm271_vm0 = vcmp.ge.s32.totalorder %v248_v9, 0  ;;  %vm273_vm1 = vcmp.lt.s32.totalorder %v248_v9, 16  ;;  %vm272_vm2 = vcmp.ge.s32.totalorder %v249_v10, 0  ;;  %vm274_vm3 = vcmp.lt.s32.totalorder %v249_v10, 16  ;;  %p592_p3 = scmp.ne.s32.totalorder %s900_s8, %s591_s28  ;;  %p982_p8 = scmp.ne.s32.totalorder %s962_s24, 0 }
  0x52   : > { %vm257_vm4 = vcmp.ge.s32.totalorder %v248_v9, 1  ;;  %vm259_vm5 = vcmp.lt.s32.totalorder %v248_v9, 17  ;;  %vm858_vm6 = vmand %vm271_vm0, %vm273_vm1  ;;  %vm258_vm7 = vcmp.ge.s32.totalorder %v249_v10, 1  ;;  %vm260_vm8 = vcmp.lt.s32.totalorder %v249_v10, 17  ;;  %s668_s29 = smov [#allocation7]  }
  0x53   : > { %vm862_vm9 = vmand %vm272_vm2, %vm274_vm3  ;;  %vm290_vm10 = vcmp.ge.s32.totalorder %v248_v9, 4294967295  ;;  %vm292_vm11 = vcmp.lt.s32.totalorder %v248_v9, 15  ;;  %vm291_vm13 = vcmp.ge.s32.totalorder %v249_v10, 4294967295  ;;  %vm293_vm14 = vcmp.lt.s32.totalorder %v249_v10, 15  ;;  %p593_p9 = pnand %p592_p3, %p982_p8  ;;  %s595_s5 = sshll.u32 %s668_s29, 4  ;;  %s596_s5 = int_to_ptr.vmem [resolvable:$false] %s595_s5 }
  0x54   : > { %vm866_vm12 = vmand %vm257_vm4, %vm259_vm5  ;;  %vm254_vm0 = vcmp.lt.s32.totalorder %v253_v17, 1  ;;  %vm287_vm1 = vcmp.lt.s32.totalorder %v253_v17, 7  ;;  %v266_v33 = vstv %s854_s6  ;;  %v299_v34 = vstv %s856_s7  ;;  %s597_s23 = scalar_lea.vmem %s596_s5, 1024  ;;  %p598_p1 = scmp.lt.s32.totalorder %s900_s8, %s596_s5 }
  0x55   : > { %vm870_vm15 = vmand %vm258_vm7, %vm260_vm8  ;;  %p594_p10 = pneg %p593_p9  ;;  %p599_p4 = scmp.lt.s32.totalorder %s597_s23, %s591_s28 }
  0x56   : > { %vm875_vm2 = vmand %vm290_vm10, %vm292_vm11 }
  0x57   : > { %vm879_vm3 = vmand %vm291_vm13, %vm293_vm14  ;;  %p600_p11 = por %p599_p4, %p598_p1 }
  0x59   : > { %p601_p0 = pnand %p600_p11, %p594_p10 }
  0xda   : > { %v234_v11 = vpop.xlane.xlu0 %233  ;;  %v242_v12 = vpop.xlane.xlu1 %241 }
  0xdb   : > { %v238_v14 = vmul.f32 0.00390625, %v234_v11 }
  0xdd   : > { %v246_v19 = vadd.f32 %v242_v12, %v238_v14 }
  0xde   : > { %v237_v16 = vpop.xlane.xlu0 %236  ;;  %v245_v18 = vpop.xlane.xlu1 %244 }
  0xdf   : > { %v239_v20 = vmul.f32 0.00390625, %v237_v16  ;;  %v250_v27 = vrot.slane %v246_v19, 7  ;;  %v285_v28 = vrot.slane %v246_v19, 1  ;;  %v278_v32 = vsel %vm858_vm6, %v246_v19, 0.0 }
  0xe0   : > { %v281_v44 = vmul.f32 %v280_v25, %v278_v32 }
  0xe1   : > { %v247_v23 = vadd.f32 %v245_v18, %v239_v20 }
  0xe3   : > { %v251_v29 = vrot.slane %v247_v23, 7  ;;  %v286_v30 = vrot.slane %v247_v23, 1  ;;  %v279_v35 = vsel %vm862_vm9, %v247_v23, 0.0 }
  0xe4   : > { %v282_v47 = vmul.f32 %v280_v25, %v279_v35 }
  0xe5   : > { %v255_v36 = vsel %vm254_vm0, %v250_v27, %v251_v29  ;;  %v256_v37 = vsel %vm254_vm0, %v251_v29, %v250_v27  ;;  %v288_v38 = vsel %vm287_vm1, %v285_v28, %v286_v30  ;;  %v289_v39 = vsel %vm287_vm1, %v286_v30, %v285_v28 }
  0xe6   : > { %v264_v40 = vsel %vm866_vm12, %v256_v37, 0.0  ;;  %v265_v41 = vsel %vm870_vm15, %v255_v36, 0.0  ;;  %v297_v42 = vsel %vm875_vm2, %v288_v38, 0.0  ;;  %v298_v43 = vsel %vm879_vm3, %v289_v39, 0.0 }
  0xe7   : > { %v267_v45 = vmul.f32 %v266_v33, %v264_v40  ;;  %v268_v46 = vmul.f32 %v266_v33, %v265_v41  ;;  %v300_v50 = vmul.f32 %v299_v34, %v297_v42  ;;  %v301_v51 = vmul.f32 %v299_v34, %v298_v43 }
  0xe9   : > { %v283_v48 = vadd.f32 %v281_v44, %v267_v45  ;;  %v284_v49 = vadd.f32 %v282_v47, %v268_v46 }
  0xeb   : > { %v302_v52 = vadd.f32 %v300_v50, %v283_v48  ;;  %v303_v53 = vadd.f32 %v301_v51, %v284_v49 }
  0xed   : > { %v462_v54 = vmul.f32 -1.442695, %v302_v52  ;;  %v463_v55 = vmul.f32 -1.442695, %v303_v53 }
  0xef   : > { %538 = vpow2.f32 %v462_v54 }
  0xf0   : > { %540 = vpow2.f32 %v463_v55 }
  0xf9   : > { %v539_v56 = vpop.eup %538 }
  0xfa   : > { %v541_v57 = vpop.eup %540  ;;  %v310_v58 = vadd.f32 1.0, %v539_v56 }
  0xfb   : > { %v311_v59 = vadd.f32 1.0, %v541_v57 }
  0xfc   : > { %542 = vrcp.f32 %v310_v58 }
  0xfd   : > { %544 = vrcp.f32 %v311_v59 }
 0x106   : > { %v543_v60 = vpop.eup %542 }
 0x107   : > { %v545_v61 = vpop.eup %544  ;;  %318 = vperm.xlu0 %536, %v543_v60  }
 0x108   : > { %323 = vperm.xlu1 %537, %v545_v61  }
 0x186   : > { %v319_v62 = vpop.permute.xlu0 %318 }
 0x187   : > { %v324_v63 = vpop.permute.xlu1 %323  ;;  %v326_v3 = vmul.f32 %v319_v62, %v832_v0  ;;  %v327_v4 = vmul.f32 %v319_v62, %v834_v1 }
 0x188   : > { %v328_v6 = vmul.f32 %v324_v63, %v836_v2  ;;  %v329_v7 = vmul.f32 %v324_v63, %v842_v5 }
 0x189   : > { %330 = vst [vmem:[%s219_s4] sm:$0xff] %v326_v3  ;;  %331 = vst [vmem:[%s219_s4 + $0x8] sm:$0xff] %v327_v4 }
 0x18a   : > { %332 = vst [vmem:[%s219_s4 + $0x10] sm:$0xff] %v328_v6  ;;  %333 = vst [vmem:[%s219_s4 + $0x18] sm:$0xff] %v329_v7 }
 0x18b   : > { %604 = shalt.err (!%p601_p0)
}
 0x18c   : > { %s605_s26 = scalar_lea.hbm %s907_s19, 512  ;;  %s609_s22 = scalar_lea.hbm %s956_s3, 1024 }
 0x18d   : > { %p606_p2 = scmp.ne.s32.totalorder %s907_s19, %s605_s26  ;;  %p610_p12 = scmp.lt.u32.totalorder %s907_s19, %s956_s3 }
 0x18e   : > { %p611_p6 = scmp.lt.u32.totalorder %s609_s22, %s605_s26  ;;  %p613_p3 = scmp.lt.u32.totalorder %s605_s26, %s907_s19 }
 0x18f   : > { %p607_p7 = pnand %p606_p2, %p982_p8 }
 0x190   : > { %p612_p13 = por %p611_p6, %p610_p12 }
 0x191   : > { %p608_p5 = pneg %p607_p7 }
 0x192   : > { %p614_p9 = por %p613_p3, %p612_p13 }
 0x194   : > { %p615_p10 = pnand %p614_p9, %p608_p5 }
 0x196   : > { %618 = shalt.err (!%p615_p10)
}
 0x197   : > { %s669_s7 = smov 256   ;;  %s670_s4 = smov 16  }
 0x198   : > { %480 = dma.vmem_to_hbm [thread:$0]  (%p982_p8), %s900_s8, 512, %s907_s19, %s335_s16, %s669_s7, %s669_s7, %s670_s4  }
 0x199 PF: > { %s364_s9 = sand.u32 1, %s649_s12   ;;  %p983_p1 = scmp.ne.s32.totalorder %s963_s25, 0 }
 0x19a   : > { %p984_p4 = scmp.ge.s32.totalorder %s661_s15, 2  ;;  %s365_s10 = scalar_lea.sflag [#allocation4], %s364_s9 }
 0x19c   : > { %p491_p11 = pnand %p984_p4, %p983_p1 }
 0x19e   : > { %644 = dma.done.wait (!%p491_p11), %s365_s10, 512  }
 0x19f   : > { %646 = vsyncadd (!%p491_p11), %s365_s10, 4294966784  ;;  %p17_p0 = scmp.ge.s32.totalorder %s716_s18, 4   ;;  %s985_s12 = smov %s653_s13 }
 0x1a0   : > { %s986_s13 = smov %s657_s14  ;;  %s987_s14 = smov %s728_s21 }
 0x1a1   : > { %s988_s15 = smov %s716_s18  ;;  %19 = sbr.rel (!%p17_p0) target bundleno = 6 (0x6), region = 85 }
 0x1a8   :  { %370 = vsyncpa [#allocation3], 1 }
 0x1a9   :  { %372 = vsyncpa [#allocation3 + $0x1], 1 }
 0x1aa   :  { %373 = vsyncpa [#allocation4], 1 }
 0x1ab   :  { %375 = vsyncpa [#allocation4 + $0x1], 1 }
 0x1ac   :  { %376 = vsyncpa [#allocation5], 1 }
 0x1ad   :  { %378 = vsyncpa [#allocation5 + $0x1], 1 }

</bundles_post_ra>
